<compile_context>
chip_gen: v6e
topology: v6e:2x2x1
jax: 0.10.0
libtpu: 0.0.40
codegen_flags: <defaults>
</compile_context>

<pallas_src>
import jax
import jax.numpy as jnp
from jax.experimental import pallas as pl
from jax.experimental.pallas import tpu as pltpu


def _cdiv(a, b):
    return (a + b - 1) // b


def _mse_partial_kernel(p_ref, t_ref, o_ref, acc_ref):
    step = pl.program_id(1)

    @pl.when(step == 0)
    def _():
        acc_ref[...] = jnp.zeros_like(acc_ref)

    # Elementwise squared difference in f32 (VPU).
    d = p_ref[...].astype(jnp.float32) - t_ref[...].astype(jnp.float32)
    d2 = d * d
    tr, ln = d2.shape
    # Fold along the leading axis into the vreg-shaped (8, lane) accumulator:
    # pure VALU adds, no per-step cross-lane reduction.
    acc_ref[...] += jnp.sum(d2.reshape(tr // 8, 8, ln), axis=0)

    @pl.when(step == pl.num_programs(1) - 1)
    def _():
        o_ref[...] = acc_ref[...]


def simple_loss(predicted, target, *, max_tile_rows=4096, lane=128):
    """MSE loss with 'mean' reduction computed by a Pallas TPU kernel."""
    assert predicted.shape == target.shape, "predicted/target must match shapes"
    n = predicted.size
    assert n > 0

    rows = _cdiv(n, lane)

    # Aim for ~max_tile_rows x lane f32 (2 MiB) blocks (2 inputs x 2 pipeline
    # buffers = 8 MiB resident: safe within v7x's 32 MiB default scoped VMEM).
    # Shard the row range across 2 TensorCores when there is enough work.
    min_steps = _cdiv(rows, max_tile_rows)
    n_cores = 2 if min_steps >= 2 else 1
    n_steps = _cdiv(min_steps, n_cores) * n_cores
    tile_rows = _cdiv(_cdiv(rows, n_steps), 8) * 8  # multiple of 8 sublanes
    total_rows = tile_rows * n_steps
    steps_per_core = n_steps // n_cores

    p_flat = jnp.ravel(predicted)
    t_flat = jnp.ravel(target)
    pad = total_rows * lane - n
    if pad:  # zero-padding both inputs contributes 0 to the squared-diff sum
        p_flat = jnp.pad(p_flat, (0, pad))
        t_flat = jnp.pad(t_flat, (0, pad))
    p2d = p_flat.reshape(total_rows, lane)
    t2d = t_flat.reshape(total_rows, lane)

    in_bytes = p2d.size * p2d.dtype.itemsize + t2d.size * t2d.dtype.itemsize
    out_bytes = n_cores * 8 * lane * 4

    partials = pl.pallas_call(
        _mse_partial_kernel,
        out_shape=jax.ShapeDtypeStruct((n_cores, 8, lane), jnp.float32),
        grid_spec=pltpu.PrefetchScalarGridSpec(
            num_scalar_prefetch=0,
            grid=(n_cores, steps_per_core),
            in_specs=[
                pl.BlockSpec((tile_rows, lane),
                             lambda c, i: (c * steps_per_core + i, 0)),
                pl.BlockSpec((tile_rows, lane),
                             lambda c, i: (c * steps_per_core + i, 0)),
            ],
            out_specs=pl.BlockSpec((None, 8, lane), lambda c, i: (c, 0, 0)),
            scratch_shapes=[pltpu.VMEM((8, lane), jnp.float32)],
        ),
        compiler_params=pltpu.CompilerParams(
            dimension_semantics=("parallel", "arbitrary"),
        ),
        cost_estimate=pl.CostEstimate(
            flops=3 * n,
            transcendentals=0,
            bytes_accessed=in_bytes + out_bytes,
        ),
    )(p2d, t2d)

    # Single tiny final reduce of the per-core partial slabs + mean scale.
    return jnp.sum(partials) * (1.0 / float(n))


if __name__ == "__main__":
    key = jax.random.PRNGKey(0)
    k1, k2 = jax.random.split(key)

    # Small DDPM-style prediction/target: (B, C, H, W).
    predicted = jax.random.normal(k1, (2, 4, 16, 16), dtype=jnp.float32)
    target = jax.random.normal(k2, (2, 4, 16, 16), dtype=jnp.float32)

    loss = simple_loss(predicted, target)
    jax.block_until_ready(loss)
    ref = jnp.mean((predicted - target) ** 2)
    assert jnp.allclose(loss, ref, rtol=1e-6, atol=1e-6), (loss, ref)

    # Also exercise the multi-tile / dual-core grid path on a moderate shape.
    k3, k4 = jax.random.split(k2)
    p_big = jax.random.normal(k3, (8, 4, 192, 192), dtype=jnp.float32)
    t_big = jax.random.normal(k4, (8, 4, 192, 192), dtype=jnp.float32)
    loss_big = simple_loss(p_big, t_big)
    jax.block_until_ready(loss_big)
    ref_big = jnp.mean((p_big - t_big) ** 2)
    assert jnp.allclose(loss_big, ref_big, rtol=1e-5, atol=1e-6), (loss_big, ref_big)

    print("KERNEL_OK")
</pallas_src>

<mosaic_0001>
module attributes {stable_mosaic.version = 11 : i64} {
  func.func @_mse_partial_kernel(%arg0: i32, %arg1: i32, %arg2: memref<16x128xf32, #tpu.memory_space<vmem>>, %arg3: memref<16x128xf32, #tpu.memory_space<vmem>>, %arg4: memref<1x8x128xf32, #tpu.memory_space<vmem>>, %arg5: memref<8x128xf32, #tpu.memory_space<vmem>>) attributes {dimension_semantics = [#tpu.dimension_semantics<parallel>, #tpu.dimension_semantics<arbitrary>], iteration_bounds = array<i64: 1, 1>, scalar_prefetch = 0 : i64, scratch_operands = 1 : i64, tpu.core_type = #tpu.core_type<tc>, window_params = [{transform_indices = @transform_0, window_bounds = array<i64: 16, 128>}, {transform_indices = @transform_1, window_bounds = array<i64: 16, 128>}, {transform_indices = @transform_2, window_bounds = array<i64: 1, 8, 128>}]} {
    %c0_i32 = arith.constant 0 : i32
    %0 = arith.cmpi eq, %arg1, %c0_i32 : i32
    %1 = arith.extui %0 : i1 to i32
    %c0_i32_0 = arith.constant 0 : i32
    %2 = arith.cmpi ne, %1, %c0_i32_0 : i32
    scf.if %2 {
      %cst_10 = arith.constant 0.000000e+00 : f32
      %15 = vector.broadcast %cst_10 : f32 to vector<8x128xf32>
      %c0_11 = arith.constant 0 : index
      %c0_12 = arith.constant 0 : index
      %16 = vector.load %arg5[%c0_11, %c0_12] : memref<8x128xf32, #tpu.memory_space<vmem>>, vector<8x128xf32>
      tpu.vector_store %arg5[%c0_11, %c0_12], %15 {strides = array<i32>} : memref<8x128xf32, #tpu.memory_space<vmem>>, vector<8x128xf32>,
    } else {
    }
    %c0 = arith.constant 0 : index
    %c0_1 = arith.constant 0 : index
    %3 = vector.load %arg2[%c0, %c0_1] : memref<16x128xf32, #tpu.memory_space<vmem>>, vector<16x128xf32>
    %c0_2 = arith.constant 0 : index
    %c0_3 = arith.constant 0 : index
    %4 = vector.load %arg3[%c0_2, %c0_3] : memref<16x128xf32, #tpu.memory_space<vmem>>, vector<16x128xf32>
    %5 = arith.subf %3, %4 : vector<16x128xf32>
    %6 = arith.mulf %5, %5 : vector<16x128xf32>
    %c0_4 = arith.constant 0 : index
    %c0_5 = arith.constant 0 : index
    %7 = vector.load %arg5[%c0_4, %c0_5] : memref<8x128xf32, #tpu.memory_space<vmem>>, vector<8x128xf32>
    %8 = vector.shape_cast %6 : vector<16x128xf32> to vector<2x8x128xf32>
    %cst = arith.constant dense<0.000000e+00> : vector<8x128xf32>
    %9 = vector.multi_reduction <add>, %8, %cst [0] : vector<2x8x128xf32> to vector<8x128xf32>
    %10 = arith.addf %7, %9 : vector<8x128xf32>
    %c0_6 = arith.constant 0 : index
    %c0_7 = arith.constant 0 : index
    %11 = vector.load %arg5[%c0_6, %c0_7] : memref<8x128xf32, #tpu.memory_space<vmem>>, vector<8x128xf32>
    tpu.vector_store %arg5[%c0_6, %c0_7], %10 {strides = array<i32>} : memref<8x128xf32, #tpu.memory_space<vmem>>, vector<8x128xf32>,
    %c0_i32_8 = arith.constant 0 : i32
    %12 = arith.cmpi eq, %arg1, %c0_i32_8 : i32
    %13 = arith.extui %12 : i1 to i32
    %c0_i32_9 = arith.constant 0 : i32
    %14 = arith.cmpi ne, %13, %c0_i32_9 : i32
    scf.if %14 {
      %c0_10 = arith.constant 0 : index
      %c0_11 = arith.constant 0 : index
      %15 = vector.load %arg5[%c0_10, %c0_11] : memref<8x128xf32, #tpu.memory_space<vmem>>, vector<8x128xf32>
      %c0_12 = arith.constant 0 : index
      %c0_13 = arith.constant 0 : index
      %c0_14 = arith.constant 0 : index
      %16 = vector.load %arg4[%c0_12, %c0_13, %c0_14] : memref<1x8x128xf32, #tpu.memory_space<vmem>>, vector<1x8x128xf32>
      %17 = vector.shape_cast %16 : vector<1x8x128xf32> to vector<8x128xf32>
      %18 = vector.shape_cast %15 : vector<8x128xf32> to vector<1x8x128xf32>
      tpu.vector_store %arg4[%c0_12, %c0_13, %c0_14], %18 {strides = array<i32>} : memref<1x8x128xf32, #tpu.memory_space<vmem>>, vector<1x8x128xf32>,
    } else {
    }
    return
  }
  func.func @transform_0(%arg0: i32, %arg1: i32) -> (i32, i32) {
    %c1_i32 = arith.constant 1 : i32
    %0 = arith.muli %arg0, %c1_i32 : i32
    %1 = arith.addi %0, %arg1 : i32
    %c0_i32 = arith.constant 0 : i32
    %c0_i32_0 = arith.constant 0 : i32
    return %1, %c0_i32 : i32, i32
  }
  func.func @transform_1(%arg0: i32, %arg1: i32) -> (i32, i32) {
    %c1_i32 = arith.constant 1 : i32
    %0 = arith.muli %arg0, %c1_i32 : i32
    %1 = arith.addi %0, %arg1 : i32
    %c0_i32 = arith.constant 0 : i32
    %c0_i32_0 = arith.constant 0 : i32
    return %1, %c0_i32 : i32, i32
  }
  func.func @transform_2(%arg0: i32, %arg1: i32) -> (i32, i32, i32) {
    %c0_i32 = arith.constant 0 : i32
    %c0_i32_0 = arith.constant 0 : i32
    %c0_i32_1 = arith.constant 0 : i32
    return %arg0, %c0_i32, %c0_i32_0 : i32, i32, i32
  }
}

</mosaic_0001>

<bundles_post_ra>
// kernel: tpu_custom_call.1
= control target key start
LH: loop header
LB: loop body
LE: loop exit
PB: predicated region body
PF: predicated region fallthrough
CT: control target
= control target key end

     0   :  { %7 = vsyncpa [#allocation4], 0  ;;  %s190_s0 = inlined_call_operand.hbm [shape: f32[16,128], index: 0, kind: input, shape index: {}]   ;;  %s191_s1 = inlined_call_operand.hbm [shape: f32[16,128], index: 1, kind: input, shape index: {}]   ;;  %s192_s2 = inlined_call_operand.hbm [shape: f32[1,8,128], index: 2, kind: output, shape index: {}]  }
   0x1   :  { %8 = vsyncpa [#allocation7], 0 }
   0x2   :  { %9 = vsyncpa [#allocation5], 0  ;;  %s161_s9 = smov [#allocation3]  }
   0x3   :  { %s19_s10 = sshll.u32 %s161_s9, 4  ;;  %s20_s10 = int_to_ptr.vmem [resolvable:$true] %s19_s10 }
   0x4   :  { %s103_s11 = scalar_lea.vmem %s20_s10, 256  ;;  %p108_p1 = scmp.lt.s32.totalorder %s20_s10, %s20_s10 }
   0x5   :  { %p104_p0 = scmp.ne.s32.totalorder %s20_s10, %s103_s11  ;;  %p109_p2 = scmp.lt.s32.totalorder %s103_s11, %s103_s11 }
   0x7   :  { %p110_p3 = por %p109_p2, %p108_p1 }
   0x9   :  { %p111_p4 = pnand %p110_p3, %p104_p0 }
   0xb   :  { %114 = shalt.err (!%p111_p4)
}
   0xc   :  { %s162_s12 = smov 128   ;;  %s163_s13 = smov 8  }
   0xd   :  { %25 = dma.hbm_to_vmem [thread:$0]  %s190_s0, 256, %s20_s10, [#allocation4], %s162_s12, %s162_s12, %s163_s13  }
   0xe   :  { %s164_s16 = smov [#allocation6]  }
   0xf   :  { %s35_s17 = sshll.u32 %s164_s16, 4  ;;  %s36_s17 = int_to_ptr.vmem [resolvable:$true] %s35_s17 }
  0x10   :  { %s123_s18 = scalar_lea.vmem %s36_s17, 256  ;;  %p128_p6 = scmp.lt.s32.totalorder %s36_s17, %s36_s17 }
  0x11   :  { %p124_p5 = scmp.ne.s32.totalorder %s36_s17, %s123_s18  ;;  %p129_p7 = scmp.lt.s32.totalorder %s123_s18, %s123_s18 }
  0x13   :  { %p130_p8 = por %p129_p7, %p128_p6 }
  0x15   :  { %p131_p9 = pnand %p130_p8, %p124_p5 }
  0x17   :  { %134 = shalt.err (!%p131_p9)
}
  0x18   :  { %41 = dma.hbm_to_vmem [thread:$0]  %s191_s1, 256, %s36_s17, [#allocation7], %s162_s12, %s162_s12, %s163_s13  }
  0x19   :  { %155 = dma.done.wait [#allocation4], 256  }
  0x1a   :  { %156 = vsyncadd [#allocation4], 4294967040 }
  0x1b   :  { %157 = dma.done.wait [#allocation7], 256  }
  0x1c   :  { %158 = vsyncadd [#allocation7], 4294967040  ;;  %v57_v0 = vld [vmem:[#allocation3] sm:$0xff]  ;;  %v58_v1 = vld [vmem:[#allocation3 + $0x8] sm:$0xff]  ;;  %s165_s0 = smov [#allocation8]  }
  0x1d   :  { %v59_v2 = vld [vmem:[#allocation6] sm:$0xff]  ;;  %v60_v3 = vld [vmem:[#allocation6 + $0x8] sm:$0xff]  ;;  %s80_s21 = sshll.u32 %s165_s0, 4  ;;  %s81_s21 = int_to_ptr.vmem [resolvable:$true] %s80_s21 }
  0x1e   :  { %v61_v4 = vsub.f32 %v57_v0, %v59_v2  ;;  %v62_v5 = vsub.f32 %v58_v1, %v60_v3  ;;  %s135_s22 = scalar_lea.vmem %s81_s21, 128  ;;  %p140_p11 = scmp.lt.s32.totalorder %s81_s21, %s81_s21 }
  0x1f   :  { %p136_p10 = scmp.ne.s32.totalorder %s81_s21, %s135_s22  ;;  %p141_p12 = scmp.lt.s32.totalorder %s135_s22, %s135_s22 }
  0x20   :  { %v63_v6 = vmul.f32 %v61_v4, %v61_v4  ;;  %v64_v7 = vmul.f32 %v62_v5, %v62_v5 }
  0x21   :  { %p142_p13 = por %p141_p12, %p140_p11 }
  0x22   :  { %v66_v8 = vadd.f32 %v64_v7, %v63_v6 }
  0x23   :  { %p143_p0 = pnand %p142_p13, %p136_p10 }
  0x24   :  { %73 = vst [vmem:[#allocation8] sm:$0xff] %v66_v8 }
  0x25   :  { %146 = shalt.err (!%p143_p0)
}
  0x26   :  { %83 = dma.vmem_to_hbm [thread:$0]  %s81_s21, 128, %s192_s2, [#allocation5]  }
  0x27   :  { %159 = dma.done.wait [#allocation5], 128  }
  0x28   :  { %160 = vsyncadd [#allocation5], 4294967168 }
  0x29   :  { %87 = vsyncpa [#allocation4], 1 }
  0x2a   :  { %88 = vsyncpa [#allocation7], 1 }
  0x2b   :  { %89 = vsyncpa [#allocation5], 1 }

</bundles_post_ra>
